<compile_context>
chip_gen: v7x
topology: tpu7x:2x2x1
jax: 0.10.0
libtpu: 0.0.40
codegen_flags: <defaults>
</compile_context>

<pallas_src>
import functools

import jax
import jax.numpy as jnp
from jax import lax
from jax.experimental import pallas as pl
from jax.experimental.pallas import tpu as pltpu


_MAX_LANES = 2048      # widest lane-dense tile (multiple of 128)
_MAX_ROWS = 1024       # rows per tile; 1024 x 2048 x f32 = 8 MiB per input tile


def _round_up(x, m):
    return ((x + m - 1) // m) * m


def _num_tensorcores():
    """Best-effort: 2 TensorCores per chip on v7x, else 1."""
    try:
        kind = (jax.devices()[0].device_kind or "").lower()
    except Exception:
        return 1
    return 2 if ("v7" in kind or "tpu7" in kind) else 1


def _choose_tiling(n_true, min_sub, n_cores):
    """Pick a lane-dense (rows, lanes) tiling.

    Prefers an exact tiling (pad == 0 -> no wrapper-side jnp.pad copy of the
    activation); falls back to zero-padding only for ragged totals.
    Returns (lanes, rows_per_tile, num_tiles, num_splits, padded_rows, pad).
    """
    exact_lanes = None
    for cand in (2048, 1024, 512, 256, 128):
        if n_true % (cand * min_sub) == 0:
            exact_lanes = cand
            break

    use_exact = exact_lanes is not None
    if use_exact:
        lanes = exact_lanes
        rows_total = n_true // lanes
        # Largest tile height (multiple of min_sub, <= _MAX_ROWS) dividing
        # rows_total exactly -> no row padding either.
        rows_per_tile = min_sub
        r = min(_MAX_ROWS, rows_total)
        r -= r % min_sub
        while r >= min_sub:
            if rows_total % r == 0:
                rows_per_tile = r
                break
            r -= min_sub
        num_tiles = rows_total // rows_per_tile
        padded_rows = rows_total
        if rows_total > _MAX_ROWS and rows_per_tile < 256:
            # Pathological factorization -> tiny tiles; padded layout is cheaper.
            use_exact = False

    if not use_exact:
        lanes = _MAX_LANES
        while lanes > 128 and n_true < lanes * min_sub:
            lanes //= 2
        rows_total = _round_up(pl.cdiv(n_true, lanes), min_sub)
        rows_per_tile = min(_MAX_ROWS, rows_total)
        num_tiles = pl.cdiv(rows_total, rows_per_tile)
        padded_rows = num_tiles * rows_per_tile

    # 2-way row split only on dual-TC chips and only when it costs no padding.
    num_splits = 2 if (n_cores == 2 and num_tiles >= 2 and num_tiles % 2 == 0) else 1
    pad = padded_rows * lanes - n_true
    return lanes, rows_per_tile, num_tiles, num_splits, padded_rows, pad


def _sumsq_diff_kernel(x_ref, t_ref, acc_ref, *, rows, lanes, sub, red_axis, unroll):
    """Accumulate sum((x - t)^2) for one row tile.

    x_ref, t_ref : (rows, lanes) tiles of flattened input / target (any float dtype)
    acc_ref      : (8, lanes) f32 output block == resident accumulator per split
    """
    i = pl.program_id(red_axis)  # reduction (inner) grid axis

    @pl.when(i == 0)
    def _():
        acc_ref[...] = jnp.zeros_like(acc_ref)

    n_chunks = rows // sub

    def body(c, partial):
        # Stream one aligned sub-row chunk straight from the refs; upcast to
        # f32 per-chunk (free VPU filler under the HBM bound).  No full-tile
        # f32 temporaries are materialized.
        r0 = pl.multiple_of(c * sub, sub)
        xc = x_ref[pl.ds(r0, sub), :].astype(jnp.float32)
        tc = t_ref[pl.ds(r0, sub), :].astype(jnp.float32)
        d = xc - tc
        sq = d * d
        for s0 in range(0, sub, 8):      # fold (sub, lanes) -> (8, lanes)
            partial = partial + sq[s0:s0 + 8, :]
        return partial

    partial = lax.fori_loop(
        0, n_chunks, body, jnp.zeros((8, lanes), jnp.float32), unroll=unroll)

    # One read-modify-write of the resident output block per grid step; the
    # cross-lane/sublane (XLU) reduce is deferred to the wrapper on a tiny array.
    acc_ref[...] += partial


def make_content_loss(target, weight, input_dtype=None):
    """Mirrors ContentLoss.__init__ (target kept unscaled; see w^2 identity).

    `input_dtype`: dtype the activations will arrive in (defaults to
    target.dtype).  The stored target is cast to it (e.g. bf16 halves its HBM
    stream); the squared-difference math stays f32 in-kernel, so precision
    impact is negligible.
    """
    target = jnp.asarray(target)
    if input_dtype is None:
        input_dtype = target.dtype
    input_dtype = jnp.dtype(input_dtype)
    weight = float(weight)
    n_true = int(target.size)

    itemsize = int(input_dtype.itemsize)
    min_sub = 8 if itemsize >= 4 else 16     # sub-32-bit dtypes pack along sublanes
    n_cores = _num_tensorcores()

    lanes, rows, num_tiles, num_splits, padded_rows, pad = _choose_tiling(
        n_true, min_sub, n_cores)
    tiles_per_split = num_tiles // num_splits

    # Target is fixed: cast / flatten / (pad) / tile once at construction time.
    t_flat = target.astype(input_dtype).reshape(-1)
    if pad:
        t_flat = jnp.pad(t_flat, (0, pad))
    t2 = t_flat.reshape(padded_rows, lanes)

    sub = min_sub
    n_chunks = rows // sub
    unroll = max(1, min(8, n_chunks))

    if num_splits == 2:
        # v7x: leading axis marked CORE_PARALLEL so each TensorCore streams
        # half the rows through its own HBM path.
        grid = (num_splits, tiles_per_split)
        row_block = lambda p, i: (p * tiles_per_split + i, 0)
        out_block = lambda p, i: (p, 0)
        semantics = (pltpu.CORE_PARALLEL, pltpu.ARBITRARY)
        red_axis = 1
    else:
        grid = (num_tiles,)
        row_block = lambda i: (i, 0)
        out_block = lambda i: (0, 0)
        semantics = ("arbitrary",)
        red_axis = 0

    # VMEM budget: 2 inputs x 2 pipeline buffers x tile + resident output + slack.
    tile_bytes = rows * lanes * itemsize
    out_bytes = num_splits * 8 * lanes * 4
    vmem_needed = 2 * 2 * tile_bytes + 2 * out_bytes + (4 << 20)
    vmem_limit = int(min(max(vmem_needed, 16 << 20), 48 << 20))

    cost = pl.CostEstimate(
        flops=3 * padded_rows * lanes,
        transcendentals=0,
        bytes_accessed=2 * padded_rows * lanes * itemsize + out_bytes,
    )

    pallas_fn = pl.pallas_call(
        functools.partial(_sumsq_diff_kernel, rows=rows, lanes=lanes,
                          sub=sub, red_axis=red_axis, unroll=unroll),
        out_shape=jax.ShapeDtypeStruct((num_splits * 8, lanes), jnp.float32),
        grid=grid,
        in_specs=[
            pl.BlockSpec((rows, lanes), row_block),   # input slab tile
            pl.BlockSpec((rows, lanes), row_block),   # target slab tile
        ],
        # Lane-dense f32 accumulator block per split; same block across the
        # reduction axis -> stays resident in VMEM, written back once.
        out_specs=pl.BlockSpec((8, lanes), out_block),
        compiler_params=pltpu.CompilerParams(
            dimension_semantics=semantics,
            vmem_limit_bytes=vmem_limit,
        ),
        cost_estimate=cost,
    )

    # MSE(w*x, w*t) = w^2/N * sum((x - t)^2)
    scale = jnp.float32(weight * weight / n_true)

    @jax.jit
    def forward(x):
        assert x.size == n_true, "input must match the target's element count"
        xi = x if x.dtype == input_dtype else x.astype(input_dtype)
        flat = xi.reshape(-1)
        if pad:   # static Python value: the pad copy only exists for ragged shapes
            flat = jnp.pad(flat, (0, pad))
        x2 = flat.reshape(padded_rows, lanes)        # free when pad == 0
        partial_slabs = pallas_fn(x2, t2)            # (num_splits*8, lanes) f32
        loss = jnp.sum(partial_slabs) * scale        # single tiny final reduce
        # ContentLoss.forward returns its input unchanged; loss is the side value.
        # TODO(synk): PyTorch's backward()/retain_graph has no Pallas analogue;
        # use jax.grad on the returned loss instead.
        return x, loss

    return forward


if __name__ == "__main__":
    key = jax.random.PRNGKey(0)
    k_x, k_t = jax.random.split(key)

    # Small NCHW feature-map shapes consistent with the module.
    x = jax.random.normal(k_x, (2, 4, 16, 16), dtype=jnp.float32)
    target = jax.random.normal(k_t, (2, 4, 16, 16), dtype=jnp.float32)
    weight = 0.75

    forward = make_content_loss(target, weight)
    out, loss = forward(x)
    out = jax.block_until_ready(out)
    loss = jax.block_until_ready(loss)

    # Reference check (same math as nn.MSELoss with mean reduction).
    ref_loss = jnp.mean((x * weight - target * weight) ** 2)
    assert out.shape == x.shape
    assert jnp.allclose(out, x)
    assert jnp.allclose(loss, ref_loss, rtol=1e-5, atol=1e-6)

    print("KERNEL_OK")
</pallas_src>

<mosaic_0001>
module attributes {stable_mosaic.version = 11 : i64} {
  func.func @_sumsq_diff_kernel(%arg0: i32, %arg1: memref<8x256xf32, #tpu.memory_space<vmem>>, %arg2: memref<8x256xf32, #tpu.memory_space<vmem>>, %arg3: memref<8x256xf32, #tpu.memory_space<vmem>>) attributes {dimension_semantics = [#tpu.dimension_semantics<arbitrary>], iteration_bounds = array<i64: 1>, scalar_prefetch = 0 : i64, scratch_operands = 0 : i64, tpu.core_type = #tpu.core_type<tc>, window_params = [{transform_indices = @transform_0, window_bounds = array<i64: 8, 256>}, {transform_indices = @transform_1, window_bounds = array<i64: 8, 256>}, {pipeline_mode = #tpu.pipeline_mode<synchronous>, transform_indices = @transform_2, window_bounds = array<i64: 8, 256>}]} {
    %c0_i32 = arith.constant 0 : i32
    %0 = arith.cmpi eq, %arg0, %c0_i32 : i32
    %1 = arith.extui %0 : i1 to i32
    %c0_i32_0 = arith.constant 0 : i32
    %2 = arith.cmpi ne, %1, %c0_i32_0 : i32
    scf.if %2 {
      %cst_7 = arith.constant 0.000000e+00 : f32
      %16 = vector.broadcast %cst_7 : f32 to vector<8x256xf32>
      %c0_8 = arith.constant 0 : index
      %c0_9 = arith.constant 0 : index
      %17 = vector.load %arg3[%c0_8, %c0_9] : memref<8x256xf32, #tpu.memory_space<vmem>>, vector<8x256xf32>
      tpu.vector_store %arg3[%c0_8, %c0_9], %16 {strides = array<i32>} : memref<8x256xf32, #tpu.memory_space<vmem>>, vector<8x256xf32>,
    } else {
    }
    %cst = arith.constant 0.000000e+00 : f32
    %3 = vector.broadcast %cst : f32 to vector<8x256xf32>
    %c0_i32_1 = arith.constant 0 : i32
    %c8_i32 = arith.constant 8 : i32
    %4 = arith.muli %c0_i32_1, %c8_i32 : i32
    %5 = tpu.assume_multiple %4, 8 : i32
    %6 = arith.index_cast %5 : i32 to index
    %c0 = arith.constant 0 : index
    %7 = vector.load %arg1[%6, %c0] : memref<8x256xf32, #tpu.memory_space<vmem>>, vector<8x256xf32>
    %8 = arith.index_cast %5 : i32 to index
    %c0_2 = arith.constant 0 : index
    %9 = vector.load %arg2[%8, %c0_2] : memref<8x256xf32, #tpu.memory_space<vmem>>, vector<8x256xf32>
    %10 = arith.subf %7, %9 : vector<8x256xf32>
    %11 = arith.mulf %10, %10 : vector<8x256xf32>
    %12 = arith.addf %3, %11 : vector<8x256xf32>
    %c1_i32 = arith.constant 1 : i32
    %c0_3 = arith.constant 0 : index
    %c0_4 = arith.constant 0 : index
    %13 = vector.load %arg3[%c0_3, %c0_4] : memref<8x256xf32, #tpu.memory_space<vmem>>, vector<8x256xf32>
    %14 = arith.addf %13, %12 : vector<8x256xf32>
    %c0_5 = arith.constant 0 : index
    %c0_6 = arith.constant 0 : index
    %15 = vector.load %arg3[%c0_5, %c0_6] : memref<8x256xf32, #tpu.memory_space<vmem>>, vector<8x256xf32>
    tpu.vector_store %arg3[%c0_5, %c0_6], %14 {strides = array<i32>} : memref<8x256xf32, #tpu.memory_space<vmem>>, vector<8x256xf32>,
    return
  }
  func.func @transform_0(%arg0: i32) -> (i32, i32) {
    %c0_i32 = arith.constant 0 : i32
    %c0_i32_0 = arith.constant 0 : i32
    return %arg0, %c0_i32 : i32, i32
  }
  func.func @transform_1(%arg0: i32) -> (i32, i32) {
    %c0_i32 = arith.constant 0 : i32
    %c0_i32_0 = arith.constant 0 : i32
    return %arg0, %c0_i32 : i32, i32
  }
  func.func @transform_2(%arg0: i32) -> (i32, i32) {
    %c0_i32 = arith.constant 0 : i32
    %c0_i32_0 = arith.constant 0 : i32
    %c0_i32_1 = arith.constant 0 : i32
    return %c0_i32, %c0_i32_0 : i32, i32
  }
}

</mosaic_0001>

<bundles_post_ra>
// kernel: forward.1
= control target key start
LH: loop header
LB: loop body
LE: loop exit
PB: predicated region body
PF: predicated region fallthrough
CT: control target
= control target key end

     0   :  { %s76_s0 = inlined_call_operand.vmem [shape: f32[8,256], index: 0, kind: input, shape index: {}]   ;;  %s77_s1 = inlined_call_operand.vmem [shape: f32[8,256], index: 1, kind: input, shape index: {}]   ;;  %s78_s2 = inlined_call_operand.vmem [shape: f32[8,256], index: 2, kind: output, shape index: {}]  }
   0x1   :  { %v20_v0 = vld [vmem:[%s76_s0] sm:$0xff]  ;;  %v21_v2 = vld [vmem:[%s76_s0 + $0x8] sm:$0xff] }
   0x2   :  { %v24_v1 = vld [vmem:[%s77_s1] sm:$0xff]  ;;  %v25_v4 = vld [vmem:[%s77_s1 + $0x8] sm:$0xff] }
   0x3   :  { %v26_v3 = vsub.f32 %v20_v0, %v24_v1  ;;  %v27_v5 = vsub.f32 %v21_v2, %v25_v4 }
   0x5   :  { %v28_v6 = vmul.f32 %v26_v3, %v26_v3  ;;  %v29_v7 = vmul.f32 %v27_v5, %v27_v5 }
   0x7   :  { %36 = vst [vmem:[%s78_s2] sm:$0xff] %v28_v6  ;;  %37 = vst [vmem:[%s78_s2 + $0x8] sm:$0xff] %v29_v7 }

</bundles_post_ra>
